<compile_context>
chip_gen: v7x
topology: tpu7x:2x2x1
jax: 0.10.0
libtpu: 0.0.40
codegen_flags: <defaults>
</compile_context>

<pallas_src>
import math

import jax
import jax.numpy as jnp
from jax.experimental import pallas as pl
from jax.experimental.pallas import tpu as pltpu

_GELU_C1 = math.sqrt(2.0 / math.pi)          # tanh-GELU constants, pre-folded
_GELU_C2 = _GELU_C1 * 0.044715

_VMEM_128M = 128 * 1024 * 1024
_UNSET = object()
_single_buffer_cache = _UNSET


def _round_up(x, m):
    return ((x + m - 1) // m) * m


def _gelu_tanh_f32(h):
    # GELU(approximate='tanh') with constants folded into the polynomial:
    # z = c1*h + c1*0.044715*h^3 = h*(c1 + c2*h*h)  -> saves one VALU mul/elem.
    z = h * (_GELU_C1 + _GELU_C2 * (h * h))
    return 0.5 * h * (1.0 + jnp.tanh(z))


# --------------------------------------------------------------------------
# Kernels
# --------------------------------------------------------------------------
def _mlp_kernel_resident(x_ref, wfc_ref, bfc_ref, wproj_ref, bproj_ref, o_ref):
    """Both weight matrices resident in VMEM; one grid axis over tokens."""
    x = x_ref[...].astype(wfc_ref.dtype)          # per-tile bf16 cast (free filler)
    h = jnp.dot(x, wfc_ref[...], preferred_element_type=jnp.float32)
    h = h + bfc_ref[...]                          # bias in f32
    g = _gelu_tanh_f32(h)
    out = jnp.dot(g.astype(wproj_ref.dtype), wproj_ref[...],
                  preferred_element_type=jnp.float32)
    o_ref[...] = (out + bproj_ref[...]).astype(o_ref.dtype)


def _mlp_kernel_streaming(x_ref, wfc_ref, bfc_ref, wproj_ref, bproj_ref,
                          o_ref, acc_ref):
    """Hidden dim streamed as an inner 'arbitrary' axis; f32 VMEM accumulator."""
    j = pl.program_id(1)

    @pl.when(j == 0)
    def _():
        acc_ref[...] = jnp.zeros_like(acc_ref)

    x = x_ref[...].astype(wfc_ref.dtype)
    h = jnp.dot(x, wfc_ref[...], preferred_element_type=jnp.float32)
    h = h + bfc_ref[...]
    g = _gelu_tanh_f32(h)
    acc_ref[...] += jnp.dot(g.astype(wproj_ref.dtype), wproj_ref[...],
                            preferred_element_type=jnp.float32)

    @pl.when(j == pl.num_programs(1) - 1)
    def _():
        o_ref[...] = (acc_ref[...] + bproj_ref[...]).astype(o_ref.dtype)


# --------------------------------------------------------------------------
# Config helpers
# --------------------------------------------------------------------------
def _vmem_capacity_bytes():
    try:
        info = pltpu.get_tpu_info()
        cap = getattr(info, "vmem_capacity_bytes", None)
        if cap:
            return int(cap)
    except Exception:
        pass
    return _VMEM_128M


def _default_config(C, H):
    vmem = _vmem_capacity_bytes()
    if vmem <= 64 * 1024 * 1024:
        # v7x-class TensorCore (64 MiB VMEM): smaller token tiles, leave
        # headroom for compiler scratch, and stream the hidden dim once the
        # resident bf16 weights (16*C^2 bytes) get big.
        tile_m = 256 if C >= 1024 else 512
        vmem_limit = 56 * 1024 * 1024
        block_h = 2048 if C >= 1024 else None
    else:
        # v5e / v6e (128 MiB VMEM): bigger token tiles amortize per-grid-step
        # overhead; weights stay fully resident at GPT-2 scale.
        tile_m = 1024
        vmem_limit = 100 * 1024 * 1024
        block_h = None
    return tile_m, vmem_limit, block_h


def _snap_block_h(H, block_h):
    """Largest lane-aligned (multiple-of-128) divisor of H that is <= block_h,
    or None -> use the resident-weight path."""
    if block_h is None or block_h >= H:
        return None
    if H % 128 != 0:
        return None            # can't lane-align streamed slabs; keep resident
    best = None
    th = 128
    while th <= min(block_h, H):
        if H % th == 0:
            best = th
        th += 128
    return best


def _single_buffer_mode():
    """Return pl.Buffered(1) if this Pallas build supports per-operand buffer
    counts in pallas_call (keeps grid-invariant weights single-buffered in
    VMEM, halving their footprint), else None."""
    global _single_buffer_cache
    if _single_buffer_cache is not _UNSET:
        return _single_buffer_cache
    try:
        mode = pl.Buffered(1)

        def _probe(x_ref, o_ref):
            o_ref[...] = x_ref[...] + 1.0

        y = pl.pallas_call(
            _probe,
            out_shape=jax.ShapeDtypeStruct((16, 128), jnp.float32),
            grid=(2,),
            in_specs=[pl.BlockSpec((8, 128), lambda i: (0, 0),
                                   pipeline_mode=mode)],
            out_specs=pl.BlockSpec((8, 128), lambda i: (i, 0)),
        )(jnp.zeros((8, 128), jnp.float32))
        jax.block_until_ready(y)
        ok = bool(jnp.all(y == 1.0))
        _single_buffer_cache = mode if ok else None
    except Exception:
        _single_buffer_cache = None
    return _single_buffer_cache


# --------------------------------------------------------------------------
# Public API
# --------------------------------------------------------------------------
def prepare_mlp_params(w_fc, b_fc, w_proj, b_proj, compute_dtype=jnp.bfloat16):
    """One-time (init-time) conversion from PyTorch nn.Linear layout.

    w_fc:   (4C, C) -> (C, 4C) in compute_dtype
    w_proj: (C, 4C) -> (4C, C) in compute_dtype
    biases stay f32, reshaped to (1, dim).
    """
    wfc_t = jnp.asarray(w_fc).T.astype(compute_dtype)
    wproj_t = jnp.asarray(w_proj).T.astype(compute_dtype)
    bfc = jnp.asarray(b_fc, jnp.float32).reshape(1, -1)
    bproj = jnp.asarray(b_proj, jnp.float32).reshape(1, -1)
    return wfc_t, bfc, wproj_t, bproj


def mlp_pallas(x, wfc_t, bfc, wproj_t, bproj, *, tile_m=None, block_h=None,
               vmem_limit_bytes=None, out_dtype=None):
    """Fused GPT-2 MLP forward.

    x: (B, T, C) float array (kept in its native dtype in HBM).
    wfc_t: (C, 4C), wproj_t: (4C, C) pre-transposed bf16 (prepare_mlp_params).
    bfc: (1, 4C) f32, bproj: (1, C) f32.
    """
    B, T, C = x.shape
    H = wfc_t.shape[1]
    M = B * T
    out_dtype = x.dtype if out_dtype is None else out_dtype

    auto_tm, auto_vmem, auto_bh = _default_config(C, H)
    tile_m = auto_tm if tile_m is None else tile_m
    vmem_limit_bytes = auto_vmem if vmem_limit_bytes is None else vmem_limit_bytes
    if block_h is None:
        block_h = auto_bh

    # Token tile: sublane aligned; aim for >=2 grid steps so megacore (v7x: two
    # TensorCores) can split the "parallel" axis even for short sequences.
    if M <= tile_m:
        TM = min(_round_up(pl.cdiv(M, 2), 8), _round_up(M, 8))
    else:
        TM = max(8, (min(tile_m, M) // 8) * 8)
    grid_m = pl.cdiv(M, TM)          # tail block handled by Pallas store masking

    x2d = x.reshape(M, C)            # no wrapper-side cast / pad / slice
    out_shape = jax.ShapeDtypeStruct((M, C), out_dtype)

    TH = _snap_block_h(H, block_h)

    if TH is None:
        # ---- resident-weight path (GPT-2-small scale / 128 MiB VMEM chips) ----
        wmode = _single_buffer_mode()
        kw = {} if wmode is None else {"pipeline_mode": wmode}
        out2d = pl.pallas_call(
            _mlp_kernel_resident,
            out_shape=out_shape,
            grid=(grid_m,),
            in_specs=[
                pl.BlockSpec((TM, C), lambda i: (i, 0)),          # x tile (pipelined)
                pl.BlockSpec((C, H), lambda i: (0, 0), **kw),     # c_fc weight (resident)
                pl.BlockSpec((1, H), lambda i: (0, 0), **kw),     # c_fc bias
                pl.BlockSpec((H, C), lambda i: (0, 0), **kw),     # c_proj weight (resident)
                pl.BlockSpec((1, C), lambda i: (0, 0), **kw),     # c_proj bias
            ],
            out_specs=pl.BlockSpec((TM, C), lambda i: (i, 0)),
            compiler_params=pltpu.CompilerParams(
                dimension_semantics=("parallel",),
                vmem_limit_bytes=vmem_limit_bytes,
            ),
        )(x2d, wfc_t, bfc, wproj_t, bproj)
    else:
        # ---- hidden-dim streaming path (large C / 64 MiB VMEM chips) ----
        out2d = pl.pallas_call(
            _mlp_kernel_streaming,
            out_shape=out_shape,
            grid=(grid_m, H // TH),
            in_specs=[
                pl.BlockSpec((TM, C), lambda i, j: (i, 0)),   # x tile, resident over j
                pl.BlockSpec((C, TH), lambda i, j: (0, j)),   # c_fc weight slab (streamed)
                pl.BlockSpec((1, TH), lambda i, j: (0, j)),   # c_fc bias slab
                pl.BlockSpec((TH, C), lambda i, j: (j, 0)),   # c_proj weight slab (streamed)
                pl.BlockSpec((1, C), lambda i, j: (0, 0)),    # c_proj bias
            ],
            out_specs=pl.BlockSpec((TM, C), lambda i, j: (i, 0)),
            scratch_shapes=[pltpu.VMEM((TM, C), jnp.float32)],
            compiler_params=pltpu.CompilerParams(
                dimension_semantics=("parallel", "arbitrary"),
                vmem_limit_bytes=vmem_limit_bytes,
            ),
        )(x2d, wfc_t, bfc, wproj_t, bproj)

    return out2d.reshape(B, T, C)


# --------------------------------------------------------------------------
# Reference + self-test
# --------------------------------------------------------------------------
def _gelu_tanh_ref(x):
    return 0.5 * x * (1.0 + jnp.tanh(_GELU_C1 * (x + 0.044715 * x ** 3)))


def mlp_ref(x, w_fc, b_fc, w_proj, b_proj):
    h = x @ w_fc.T + b_fc
    g = _gelu_tanh_ref(h)
    return g @ w_proj.T + b_proj


def _make_case(key, B, T, C):
    H = 4 * C
    kx, kwf, kbf, kwp, kbp = jax.random.split(key, 5)
    x = jax.random.normal(kx, (B, T, C), dtype=jnp.float32)
    # Parameter shapes match nn.Linear(C, 4C) and nn.Linear(4C, C).
    w_fc = jax.random.normal(kwf, (H, C), dtype=jnp.float32) * 0.02
    b_fc = jax.random.normal(kbf, (H,), dtype=jnp.float32) * 0.02
    w_proj = jax.random.normal(kwp, (C, H), dtype=jnp.float32) * 0.02
    b_proj = jax.random.normal(kbp, (C,), dtype=jnp.float32) * 0.02
    return x, w_fc, b_fc, w_proj, b_proj


if __name__ == "__main__":
    key = jax.random.PRNGKey(0)
    k1, k2 = jax.random.split(key)

    # 1) Small shapes consistent with the module: batch=2, seq=8, n_embd=32.
    x, w_fc, b_fc, w_proj, b_proj = _make_case(k1, 2, 8, 32)
    params = prepare_mlp_params(w_fc, b_fc, w_proj, b_proj)
    out = jax.block_until_ready(mlp_pallas(x, *params))
    ref = mlp_ref(x, w_fc, b_fc, w_proj, b_proj)
    assert out.shape == x.shape and out.dtype == x.dtype
    assert jnp.allclose(out, ref, atol=1e-2, rtol=1e-2), (
        float(jnp.max(jnp.abs(out - ref))))

    # 2) GPT-2-small width (C=768) with a token count that does NOT divide the
    #    tile -> exercises real lane width, VMEM sizing and tail-block masking.
    x, w_fc, b_fc, w_proj, b_proj = _make_case(k2, 2, 100, 768)
    params = prepare_mlp_params(w_fc, b_fc, w_proj, b_proj)
    ref = mlp_ref(x, w_fc, b_fc, w_proj, b_proj)

    out_res = jax.block_until_ready(mlp_pallas(x, *params))           # resident weights
    assert jnp.allclose(out_res, ref, atol=2e-2, rtol=2e-2), (
        float(jnp.max(jnp.abs(out_res - ref))))

    # Hidden-dim streaming path (what large-C configs use on v7x); forced here
    # so the accumulator init/finalize logic is validated too.
    out_str = jax.block_until_ready(mlp_pallas(x, *params, block_h=1024))
    assert jnp.allclose(out_str, ref, atol=2e-2, rtol=2e-2), (
        float(jnp.max(jnp.abs(out_str - ref))))

    print("KERNEL_OK")
</pallas_src>

<mosaic_0001>
module attributes {stable_mosaic.version = 11 : i64} {
  func.func @_probe(%arg0: i32, %arg1: memref<8x128xf32, #tpu.memory_space<vmem>>, %arg2: memref<8x128xf32, #tpu.memory_space<vmem>>) attributes {dimension_semantics = [#tpu.dimension_semantics<arbitrary>], iteration_bounds = array<i64: 2>, scalar_prefetch = 0 : i64, scratch_operands = 0 : i64, tpu.core_type = #tpu.core_type<tc>, window_params = [{pipeline_mode = #tpu.pipeline_mode<synchronous>, transform_indices = @transform_0, window_bounds = array<i64: 8, 128>}, {transform_indices = @transform_1, window_bounds = array<i64: 8, 128>}]} {
    %c0 = arith.constant 0 : index
    %c0_0 = arith.constant 0 : index
    %0 = vector.load %arg1[%c0, %c0_0] : memref<8x128xf32, #tpu.memory_space<vmem>>, vector<8x128xf32>
    %cst = arith.constant 1.000000e+00 : f32
    %1 = vector.broadcast %cst : f32 to vector<8x128xf32>
    %2 = arith.addf %0, %1 : vector<8x128xf32>
    %c0_1 = arith.constant 0 : index
    %c0_2 = arith.constant 0 : index
    %3 = vector.load %arg2[%c0_1, %c0_2] : memref<8x128xf32, #tpu.memory_space<vmem>>, vector<8x128xf32>
    tpu.vector_store %arg2[%c0_1, %c0_2], %2 {strides = array<i32>} : memref<8x128xf32, #tpu.memory_space<vmem>>, vector<8x128xf32>,
    return
  }
  func.func @transform_0(%arg0: i32) -> (i32, i32) {
    %c0_i32 = arith.constant 0 : i32
    %c0_i32_0 = arith.constant 0 : i32
    %c0_i32_1 = arith.constant 0 : i32
    return %c0_i32, %c0_i32_0 : i32, i32
  }
  func.func @transform_1(%arg0: i32) -> (i32, i32) {
    %c0_i32 = arith.constant 0 : i32
    %c0_i32_0 = arith.constant 0 : i32
    return %arg0, %c0_i32 : i32, i32
  }
}

module attributes {stable_mosaic.version = 11 : i64} {
  func.func @_mlp_kernel_resident(%arg0: i32, %arg1: memref<8x32xf32, #tpu.memory_space<vmem>>, %arg2: memref<32x128xbf16, #tpu.memory_space<vmem>>, %arg3: memref<1x128xf32, #tpu.memory_space<vmem>>, %arg4: memref<128x32xbf16, #tpu.memory_space<vmem>>, %arg5: memref<1x32xf32, #tpu.memory_space<vmem>>, %arg6: memref<8x32xf32, #tpu.memory_space<vmem>>) attributes {dimension_semantics = [#tpu.dimension_semantics<parallel>], iteration_bounds = array<i64: 2>, scalar_prefetch = 0 : i64, scratch_operands = 0 : i64, tpu.core_type = #tpu.core_type<tc>, window_params = [{transform_indices = @transform_0, window_bounds = array<i64: 8, 32>}, {pipeline_mode = #tpu.pipeline_mode<synchronous>, transform_indices = @transform_1, window_bounds = array<i64: 32, 128>}, {pipeline_mode = #tpu.pipeline_mode<synchronous>, transform_indices = @transform_2, window_bounds = array<i64: 1, 128>}, {pipeline_mode = #tpu.pipeline_mode<synchronous>, transform_indices = @transform_3, window_bounds = array<i64: 128, 32>}, {pipeline_mode = #tpu.pipeline_mode<synchronous>, transform_indices = @transform_4, window_bounds = array<i64: 1, 32>}, {transform_indices = @transform_5, window_bounds = array<i64: 8, 32>}]} {
    %c0 = arith.constant 0 : index
    %c0_0 = arith.constant 0 : index
    %0 = vector.load %arg1[%c0, %c0_0] : memref<8x32xf32, #tpu.memory_space<vmem>>, vector<8x32xf32>
    %1 = arith.truncf %0 : vector<8x32xf32> to vector<8x32xbf16>
    %c0_1 = arith.constant 0 : index
    %c0_2 = arith.constant 0 : index
    %2 = vector.load %arg2[%c0_1, %c0_2] : memref<32x128xbf16, #tpu.memory_space<vmem>>, vector<32x128xbf16>
    %cst = arith.constant dense<0.000000e+00> : vector<8x128xf32>
    %3 = tpu.matmul %1, %2, %cst {dimension_numbers = #tpu.dot_dimension_numbers<[1], [0], [0], [1], [0, 0, 1, 1], [], []>} : vector<8x32xbf16>, vector<32x128xbf16>, vector<8x128xf32> -> vector<8x128xf32>
    %c0_3 = arith.constant 0 : index
    %c0_4 = arith.constant 0 : index
    %4 = vector.load %arg3[%c0_3, %c0_4] : memref<1x128xf32, #tpu.memory_space<vmem>>, vector<1x128xf32>
    %5 = vector.broadcast %4 : vector<1x128xf32> to vector<8x128xf32>
    %6 = arith.addf %3, %5 : vector<8x128xf32>
    %7 = arith.mulf %6, %6 : vector<8x128xf32>
    %cst_5 = arith.constant 0.0356774069 : f32
    %8 = vector.broadcast %cst_5 : f32 to vector<8x128xf32>
    %9 = arith.mulf %8, %7 : vector<8x128xf32>
    %cst_6 = arith.constant 0.797884583 : f32
    %10 = vector.broadcast %cst_6 : f32 to vector<8x128xf32>
    %11 = arith.addf %10, %9 : vector<8x128xf32>
    %12 = arith.mulf %6, %11 : vector<8x128xf32>
    %cst_7 = arith.constant 5.000000e-01 : f32
    %13 = vector.broadcast %cst_7 : f32 to vector<8x128xf32>
    %14 = arith.mulf %13, %6 : vector<8x128xf32>
    %15 = math.tanh %12 : vector<8x128xf32>
    %cst_8 = arith.constant 1.000000e+00 : f32
    %16 = vector.broadcast %cst_8 : f32 to vector<8x128xf32>
    %17 = arith.addf %16, %15 : vector<8x128xf32>
    %18 = arith.mulf %14, %17 : vector<8x128xf32>
    %19 = arith.truncf %18 : vector<8x128xf32> to vector<8x128xbf16>
    %c0_9 = arith.constant 0 : index
    %c0_10 = arith.constant 0 : index
    %20 = vector.load %arg4[%c0_9, %c0_10] : memref<128x32xbf16, #tpu.memory_space<vmem>>, vector<128x32xbf16>
    %cst_11 = arith.constant dense<0.000000e+00> : vector<8x32xf32>
    %21 = tpu.matmul %19, %20, %cst_11 {dimension_numbers = #tpu.dot_dimension_numbers<[1], [0], [0], [1], [0, 0, 1, 1], [], []>} : vector<8x128xbf16>, vector<128x32xbf16>, vector<8x32xf32> -> vector<8x32xf32>
    %c0_12 = arith.constant 0 : index
    %c0_13 = arith.constant 0 : index
    %22 = vector.load %arg5[%c0_12, %c0_13] : memref<1x32xf32, #tpu.memory_space<vmem>>, vector<1x32xf32>
    %23 = vector.broadcast %22 : vector<1x32xf32> to vector<8x32xf32>
    %24 = arith.addf %21, %23 : vector<8x32xf32>
    %c0_14 = arith.constant 0 : index
    %c0_15 = arith.constant 0 : index
    %25 = vector.load %arg6[%c0_14, %c0_15] : memref<8x32xf32, #tpu.memory_space<vmem>>, vector<8x32xf32>
    tpu.vector_store %arg6[%c0_14, %c0_15], %24 {strides = array<i32>} : memref<8x32xf32, #tpu.memory_space<vmem>>, vector<8x32xf32>,
    return
  }
  func.func @transform_0(%arg0: i32) -> (i32, i32) {
    %c0_i32 = arith.constant 0 : i32
    %c0_i32_0 = arith.constant 0 : i32
    return %arg0, %c0_i32 : i32, i32
  }
  func.func @transform_1(%arg0: i32) -> (i32, i32) {
    %c0_i32 = arith.constant 0 : i32
    %c0_i32_0 = arith.constant 0 : i32
    %c0_i32_1 = arith.constant 0 : i32
    return %c0_i32, %c0_i32_0 : i32, i32
  }
  func.func @transform_2(%arg0: i32) -> (i32, i32) {
    %c0_i32 = arith.constant 0 : i32
    %c0_i32_0 = arith.constant 0 : i32
    %c0_i32_1 = arith.constant 0 : i32
    return %c0_i32, %c0_i32_0 : i32, i32
  }
  func.func @transform_3(%arg0: i32) -> (i32, i32) {
    %c0_i32 = arith.constant 0 : i32
    %c0_i32_0 = arith.constant 0 : i32
    %c0_i32_1 = arith.constant 0 : i32
    return %c0_i32, %c0_i32_0 : i32, i32
  }
  func.func @transform_4(%arg0: i32) -> (i32, i32) {
    %c0_i32 = arith.constant 0 : i32
    %c0_i32_0 = arith.constant 0 : i32
    %c0_i32_1 = arith.constant 0 : i32
    return %c0_i32, %c0_i32_0 : i32, i32
  }
  func.func @transform_5(%arg0: i32) -> (i32, i32) {
    %c0_i32 = arith.constant 0 : i32
    %c0_i32_0 = arith.constant 0 : i32
    return %arg0, %c0_i32 : i32, i32
  }
}

</mosaic_0001>

<bundles_post_ra>
// kernel: tpu_custom_call.1
= control target key start
LH: loop header
LB: loop body
LE: loop exit
PB: predicated region body
PF: predicated region fallthrough
CT: control target
= control target key end

     0   :  { %6 = vsyncpa [#allocation3], 0  ;;  %s482_s0 = inlined_call_operand.hbm [shape: f32[8,128], index: 0, kind: input, shape index: {}]   ;;  %s483_s1 = inlined_call_operand.hbm [shape: f32[16,128], index: 1, kind: output, shape index: {}]  }
   0x1   :  { %7 = vsyncpa [#allocation4], 0 }
   0x2   :  { %9 = vsyncpa [#allocation4 + $0x1], 0  ;;  %s352_s6 = smov 0   ;;  %s354_s7 = smov 0  }
   0x3   :  { %s356_s8 = smov 0   ;;  %s358_s9 = smov 0  }
   0x4 LB: > { %s373_s10 = sadd.s32 4294967295, %s338_s9   ;;  %s184_s11 = sadd.s32 4294967294, %s338_s9   ;;  %s338_s9 = sphi %s358_s9, %s499_s9   ;;  %s334_s8 = sphi %s356_s8, %s498_s8   ;;  %s330_s7 = sphi %s354_s7, %s497_s7   ;;  %s326_s6 = sphi %s352_s6, %s496_s6  }
   0x5   : > { %s377_s12 = sadd.s32 1, %s338_s9   ;;  %s43_s13 = sadd.s32 1, %s334_s8 }
   0x6   : > { %s40_s14 = ssub.s32 %s338_s9, %s377_s12  ;;  %p53_p0 = scmp.ne.s32.totalorder %s334_s8, %s330_s7 }
   0x7   : > { %p41_p1 = scmp.eq.s32.totalorder %s40_s14, 0  ;;  %p54_p2 = scmp.eq.s32.totalorder %s373_s10, 1 }
   0x8   : > { %p59_p3 = scmp.ne.s32.totalorder %s330_s7, %s326_s6  ;;  %p60_p4 = scmp.eq.s32.totalorder %s184_s11, 1 }
   0x9   : > { %s388_s15 = scalar_select %p41_p1, %s334_s8, %s43_s13  }
   0xa   : > { %p390_p5 = por %p54_p2, %p53_p0  ;;  %p394_p6 = por %p60_p4, %p59_p3 }
   0xb   : > { %p185_p7 = scmp.ge.s32.totalorder %s338_s9, 1  ;;  %p67_p8 = scmp.lt.s32.totalorder %s338_s9, 3 }
   0xc   : > { %s487_s16 = scalar_select %p390_p5, 1, 0 }
   0xd   : > { %s488_s17 = scalar_select %p394_p6, 1, 0 }
   0xe   : > { %p484_p9 = scmp.eq.s32.totalorder %s373_s10, 0  ;;  %p401_p10 = pnand %p185_p7, %p67_p8 }
   0xf   : > { %s340_s19 = smov [#allocation2]   ;;  %s244_s24 = scalar_lea.hbm %s482_s0, 128 }
  0x10   : > { %s489_s18 = scalar_select %p401_p10, 1, 0 }
  0x11   : > { %s80_s20 = sshll.u32 %s340_s19, 4  ;;  %p200_p11 = pneg %p401_p10  ;;  %s81_s20 = int_to_ptr.vmem [resolvable:$true] %s80_s20 }
  0x12   : > { %p245_p13 = scmp.ne.s32.totalorder %s482_s0, %s244_s24  ;;  %p251_p3 = scmp.lt.u32.totalorder %s244_s24, %s482_s0 }
  0x13   : > { %p409_p12 = pnand %p484_p9, %p200_p11 }
  0x15   : > { %p246_p0 = pneg %p409_p12 }
  0x17   : > { %p247_p1 = pnand %p246_p0, %p245_p13 }
  0x19   : > { %p248_p2 = pneg %p247_p1 }
  0x1b   : > { %p253_p4 = pnand %p251_p3, %p248_p2 }
  0x1d   : > { %256 = shalt.err (!%p253_p4)
}
  0x1e   : > { %s257_s29 = scalar_lea.vmem %s81_s20, 128  ;;  %p265_p9 = scmp.lt.s32.totalorder %s81_s20, %s81_s20 }
  0x1f   : > { %p258_p7 = scmp.ne.s32.totalorder %s81_s20, %s257_s29  ;;  %p266_p6 = scmp.lt.s32.totalorder %s257_s29, %s257_s29 }
  0x21   : > { %p260_p8 = pnand %p258_p7, %p246_p0  ;;  %p267_p5 = por %p266_p6, %p265_p9 }
  0x23   : > { %p261_p11 = pneg %p260_p8 }
  0x25   : > { %p268_p10 = pnand %p267_p5, %p261_p11 }
  0x27   : > { %271 = shalt.err (!%p268_p10)
}
  0x28   : > { %203 = dma.hbm_to_vmem [thread:$0]  (!%p409_p12), %s482_s0, 128, %s81_s20, [#allocation3]  }
  0x29   : > { %p491_p13 = scmp.ne.s32.totalorder %s489_s18, 0 }
  0x2a   : > { %p492_p1 = scmp.eq.s32.totalorder (!%p491_p13), %s373_s10, 0 }
  0x2b   : > { %93 = sbr.rel (%p491_p13) target bundleno = 77 (0x4d), region = 24 }
  0x32   : > { %317 = dma.done.wait (%p492_p1), [#allocation3], 128   ;;  %p493_p0 = pmov %p492_p1 }
  0x33   : > { %s105_s3 = sand.u32 1, %s330_s7   ;;  %s191_s13 = sshll.u32 %s373_s10, 7  ;;  %v108_v0 = vld [vmem:[#allocation2] sm:$0xff] }
  0x34   : > { %319 = vsyncadd (%p493_p0), [#allocation3], 4294967168  ;;  %s189_s4 = sshll.u32 %s105_s3, 3  ;;  %v109_v1 = vadd.f32 1.0, %v108_v0  ;;  %s442_s19 = scalar_lea.hbm %s483_s1, %s191_s13 }
  0x35   : > { %s107_s5 = scalar_lea.vmem [#allocation5], %s189_s4  ;;  %s112_s20 = scalar_lea.sflag [#allocation4], %s105_s3 }
  0x36   : > { %s125_s11 = sshll.u32 %s107_s5, 4  ;;  %110 = vst [vmem:[%s107_s5] sm:$0xff] %v109_v1  ;;  %p494_p6 = scmp.ne.s32.totalorder %s487_s16, 0  ;;  %s437_s11 = int_to_ptr.vmem [resolvable:$true] %s125_s11 }
  0x37   : > { %s272_s21 = scalar_lea.vmem %s437_s11, 128  ;;  %s341_s10 = smov [#allocation5]  }
  0x38   : > { %p273_p5 = scmp.ne.s32.totalorder %s437_s11, %s272_s21  ;;  %s276_s22 = sshll.u32 %s341_s10, 4  ;;  %s277_s22 = int_to_ptr.vmem [resolvable:$false] %s276_s22 }
  0x39   : > { %s278_s23 = scalar_lea.vmem %s277_s22, 256  ;;  %p279_p12 = scmp.lt.s32.totalorder %s437_s11, %s277_s22 }
  0x3a   : > { %p274_p9 = pnand %p273_p5, %p494_p6  ;;  %p280_p2 = scmp.lt.s32.totalorder %s278_s23, %s272_s21 }
  0x3c   : > { %p275_p10 = pneg %p274_p9  ;;  %p281_p3 = por %p280_p2, %p279_p12 }
  0x3e   : > { %p282_p4 = pnand %p281_p3, %p275_p10 }
  0x40   : > { %285 = shalt.err (!%p282_p4)
}
  0x41   : > { %s286_s24 = scalar_lea.hbm %s442_s19, 128  ;;  %s290_s27 = scalar_lea.hbm %s483_s1, 256 }
  0x42   : > { %p287_p7 = scmp.ne.s32.totalorder %s442_s19, %s286_s24  ;;  %p291_p13 = scmp.lt.u32.totalorder %s442_s19, %s483_s1 }
  0x43   : > { %p292_p1 = scmp.lt.u32.totalorder %s290_s27, %s286_s24  ;;  %p294_p5 = scmp.lt.u32.totalorder %s286_s24, %s442_s19 }
  0x44   : > { %p288_p8 = pnand %p287_p7, %p494_p6 }
  0x45   : > { %p293_p0 = por %p292_p1, %p291_p13 }
  0x46   : > { %p289_p11 = pneg %p288_p8 }
  0x47   : > { %p295_p9 = por %p294_p5, %p293_p0 }
  0x49   : > { %p296_p10 = pnand %p295_p9, %p289_p11 }
  0x4b   : > { %299 = shalt.err (!%p296_p10)
}
  0x4c   : > { %198 = dma.vmem_to_hbm [thread:$0]  (%p494_p6), %s437_s11, 128, %s442_s19, %s112_s20  }
  0x4d PF: > { %p210_p12 = scmp.ge.s32.totalorder %s338_s9, 2  ;;  %s137_s30 = sand.u32 1, %s326_s6  }
  0x4e   : > { %p495_p2 = scmp.ne.s32.totalorder %s488_s17, 0  ;;  %s138_s2 = scalar_lea.sflag [#allocation4], %s137_s30 }
  0x50   : > { %p205_p3 = pnand %p210_p12, %p495_p2 }
  0x52   : > { %321 = dma.done.wait (!%p205_p3), %s138_s2, 128  }
  0x53   : > { %323 = vsyncadd (!%p205_p3), %s138_s2, 4294967168  ;;  %p12_p4 = scmp.ge.s32.totalorder %s377_s12, 4   ;;  %s496_s6 = smov %s330_s7 }
  0x54   : > { %s497_s7 = smov %s334_s8  ;;  %s498_s8 = smov %s388_s15 }
  0x55   : > { %s499_s9 = smov %s377_s12  ;;  %14 = sbr.rel (!%p12_p4) target bundleno = 4 (0x4), region = 61 }
  0x5c   :  { %143 = vsyncpa [#allocation3], 1 }
  0x5d   :  { %145 = vsyncpa [#allocation3 + $0x1], 1 }
  0x5e   :  { %146 = vsyncpa [#allocation4], 1 }
  0x5f   :  { %148 = vsyncpa [#allocation4 + $0x1], 1 }

// kernel: tpu_custom_call.1
= control target key start
LH: loop header
LB: loop body
LE: loop exit
PB: predicated region body
PF: predicated region fallthrough
CT: control target
= control target key end

     0   :  { %10 = vsyncpa [#allocation3], 0  ;;  %s1328_s0 = inlined_call_operand.hbm [shape: f32[16,32], index: 0, kind: input, shape index: {}]   ;;  %s1329_s1 = inlined_call_operand.hbm [shape: bf16[32,128], index: 1, kind: input, shape index: {}]   ;;  %s1330_s2 = inlined_call_operand.hbm [shape: f32[1,128], index: 2, kind: input, shape index: {}]   ;;  %s1331_s3 = inlined_call_operand.hbm [shape: bf16[128,32], index: 3, kind: input, shape index: {}]   ;;  %s1332_s4 = inlined_call_operand.hbm [shape: f32[1,32], index: 4, kind: input, shape index: {}]   ;;  %s1333_s5 = inlined_call_operand.hbm [shape: f32[16,32], index: 5, kind: output, shape index: {}]  }
   0x1   :  { %12 = vsyncpa [#allocation3 + $0x1], 0 }
   0x2   :  { %13 = vsyncpa [#allocation6], 0 }
   0x3   :  { %14 = vsyncpa [#allocation9], 0 }
   0x4   :  { %15 = vsyncpa [#allocation4], 0 }
   0x5   :  { %17 = vsyncpa [#allocation4 + $0x1], 0  ;;  %s1041_s18 = smov 0   ;;  %s1043_s19 = smov 0  }
   0x6   :  { %s1045_s20 = smov 0   ;;  %s1047_s21 = smov 0  }
   0x7 LB: > { %s1001_s22 = smov [#allocation5]   ;;  %s1062_s24 = sadd.s32 4294967295, %s999_s21   ;;  %s999_s21 = sphi %s1047_s21, %s1357_s21   ;;  %s995_s20 = sphi %s1045_s20, %s1356_s20   ;;  %s991_s19 = sphi %s1043_s19, %s1355_s19   ;;  %s987_s18 = sphi %s1041_s18, %s1354_s18  }
   0x8   : > { %s176_s23 = sshll.u32 %s1001_s22, 4  ;;  %p608_p0 = scmp.ge.s32.totalorder %s999_s21, 1  ;;  %s1067_s23 = int_to_ptr.vmem [resolvable:$true] %s176_s23 }
   0x9   : > { %p1334_p1 = scmp.eq.s32.totalorder %s1062_s24, 0  ;;  %p164_p2 = scmp.lt.s32.totalorder %s999_s21, 3 }
   0xa   : > { %s1002_s26 = smov [#allocation8]   ;;  %s1003_s29 = smov [#allocation7]  }
   0xb   : > { %p1069_p3 = pnand %p608_p0, %p164_p2  ;;  %s200_s27 = sshll.u32 %s1002_s26, 4  ;;  %s1082_s27 = int_to_ptr.vmem [resolvable:$true] %s200_s27 }
   0xc   : > { %s190_s30 = sshll.u32 %s1003_s29, 4  ;;  %s783_s8 = scalar_lea.hbm %s1329_s1, 256  ;;  %s1084_s30 = int_to_ptr.vmem [resolvable:$true] %s190_s30 }
   0xd   : > { %s1337_s25 = scalar_select %p1069_p3, 1, 0 }
   0xe   : > { %p700_p5 = pneg %p1069_p3  ;;  %p784_p7 = scmp.ne.s32.totalorder %s1329_s1, %s783_s8 }
   0xf   : > { %p790_p11 = scmp.lt.u32.totalorder %s783_s8, %s1329_s1 }
  0x10   : > { %p1078_p6 = pnand %p700_p5, %p1334_p1 }
  0x12   : > { %p1094_p8 = pneg %p1078_p6 }
  0x14   : > { %p786_p9 = pnand %p1094_p8, %p784_p7 }
  0x16   : > { %p787_p10 = pneg %p786_p9 }
  0x18   : > { %p792_p12 = pnand %p790_p11, %p787_p10 }
  0x1a   : > { %795 = shalt.err (!%p792_p12)
}
  0x1b   : > { %s796_s14 = scalar_lea.vmem %s1067_s23, 256  ;;  %p804_p5 = scmp.lt.s32.totalorder %s1067_s23, %s1067_s23 }
  0x1c   : > { %p797_p13 = scmp.ne.s32.totalorder %s1067_s23, %s796_s14  ;;  %p805_p4 = scmp.lt.s32.totalorder %s796_s14, %s796_s14 }
  0x1e   : > { %p799_p0 = pnand %p797_p13, %p1094_p8  ;;  %p806_p7 = por %p805_p4, %p804_p5 }
  0x20   : > { %p800_p2 = pneg %p799_p0 }
  0x22   : > { %p807_p9 = pnand %p806_p7, %p800_p2 }
  0x24   : > { %810 = shalt.err (!%p807_p9)
}
  0x25   : > { %s1004_s15 = smov 64   ;;  %s1005_s16 = smov 4  }
  0x26   : > { %703 = dma.hbm_to_vmem [thread:$0]  (!%p1078_p6), %s1329_s1, 256, %s1067_s23, [#allocation6], %s1004_s15, %s1004_s15, %s1005_s16  }
  0x27   : > { %s811_s6 = scalar_lea.hbm %s1331_s3, 1024 }
  0x28   : > { %p812_p4 = scmp.ne.s32.totalorder %s1331_s3, %s811_s6  ;;  %p818_p12 = scmp.lt.u32.totalorder %s811_s6, %s1331_s3 }
  0x2a   : > { %p814_p10 = pnand %p812_p4, %p1094_p8 }
  0x2c   : > { %p815_p11 = pneg %p814_p10 }
  0x2e   : > { %p820_p13 = pnand %p818_p12, %p815_p11 }
  0x30   : > { %823 = shalt.err (!%p820_p13)
}
  0x31   : > { %s824_s23 = scalar_lea.vmem %s1082_s27, 1024  ;;  %p832_p7 = scmp.lt.s32.totalorder %s1082_s27, %s1082_s27 }
  0x32   : > { %p825_p0 = scmp.ne.s32.totalorder %s1082_s27, %s824_s23  ;;  %p833_p9 = scmp.lt.s32.totalorder %s824_s23, %s824_s23 }
  0x34   : > { %p827_p2 = pnand %p825_p0, %p1094_p8  ;;  %p834_p4 = por %p833_p9, %p832_p7 }
  0x36   : > { %p828_p5 = pneg %p827_p2 }
  0x38   : > { %p835_p10 = pnand %p834_p4, %p828_p5 }
  0x3a   : > { %838 = shalt.err (!%p835_p10)
}
  0x3b   : > { %709 = dma.hbm_to_vmem [thread:$0]  (!%p1078_p6), %s1331_s3, 1024, %s1082_s27, [#allocation9], %s1004_s15, %s1004_s15, %s1005_s16  }
  0x3c   : > { %s839_s22 = scalar_lea.hbm %s1330_s2, 16 }
  0x3d   : > { %p840_p11 = scmp.ne.s32.totalorder %s1330_s2, %s839_s22  ;;  %p846_p0 = scmp.lt.u32.totalorder %s839_s22, %s1330_s2 }
  0x3f   : > { %p842_p12 = pnand %p840_p11, %p1094_p8 }
  0x41   : > { %p843_p13 = pneg %p842_p12 }
  0x43   : > { %p848_p2 = pnand %p846_p0, %p843_p13 }
  0x45   : > { %851 = shalt.err (!%p848_p2)
}
  0x46   : > { %s852_s27 = scalar_lea.vmem %s1084_s30, 16  ;;  %s859_s15 = scalar_lea.vmem %s1084_s30, 32 }
  0x47   : > { %p853_p5 = scmp.ne.s32.totalorder %s1084_s30, %s852_s27  ;;  %p860_p4 = scmp.lt.s32.totalorder %s1084_s30, %s1084_s30 }
  0x48   : > { %p861_p10 = scmp.lt.s32.totalorder %s859_s15, %s852_s27 }
  0x49   : > { %p855_p7 = pnand %p853_p5, %p1094_p8 }
  0x4a   : > { %p862_p11 = por %p861_p10, %p860_p4 }
  0x4b   : > { %p856_p9 = pneg %p855_p7 }
  0x4d   : > { %p863_p12 = pnand %p862_p11, %p856_p9 }
  0x4f   : > { %866 = shalt.err (!%p863_p12)
}
  0x50   : > { %706 = dma.hbm_to_vmem [thread:$0]  (!%p1078_p6), %s1330_s2, 16, %s1084_s30, [#allocation6]  }
  0x51   : > { %s1006_s9 = smov [#allocation10]   ;;  %s867_s13 = scalar_lea.hbm %s1332_s4, 16 }
  0x52   : > { %s214_s10 = sshll.u32 %s1006_s9, 4  ;;  %p868_p13 = scmp.ne.s32.totalorder %s1332_s4, %s867_s13  ;;  %s215_s10 = int_to_ptr.vmem [resolvable:$true] %s214_s10 }
  0x53   : > { %p874_p5 = scmp.lt.u32.totalorder %s867_s13, %s1332_s4 }
  0x54   : > { %p870_p0 = pnand %p868_p13, %p1094_p8 }
  0x56   : > { %p871_p2 = pneg %p870_p0 }
  0x58   : > { %p876_p7 = pnand %p874_p5, %p871_p2 }
  0x5a   : > { %879 = shalt.err (!%p876_p7)
}
  0x5b   : > { %s880_s30 = scalar_lea.vmem %s215_s10, 16  ;;  %s887_s29 = scalar_lea.vmem %s215_s10, 32 }
  0x5c   : > { %p881_p9 = scmp.ne.s32.totalorder %s215_s10, %s880_s30  ;;  %p888_p11 = scmp.lt.s32.totalorder %s215_s10, %s215_s10 }
  0x5d   : > { %p889_p12 = scmp.lt.s32.totalorder %s887_s29, %s880_s30 }
  0x5e   : > { %p883_p4 = pnand %p881_p9, %p1094_p8 }
  0x5f   : > { %p890_p1 = por %p889_p12, %p888_p11 }
  0x60   : > { %p884_p10 = pneg %p883_p4 }
  0x62   : > { %p891_p3 = pnand %p890_p1, %p884_p10 }
  0x64   : > { %894 = shalt.err (!%p891_p3)
}
  0x65   : > { %712 = dma.hbm_to_vmem [thread:$0]  (!%p1078_p6), %s1332_s4, 16, %s215_s10, [#allocation9]  }
  0x66   : > { %s607_s11 = sadd.s32 4294967294, %s999_s21   ;;  %s1182_s28 = sadd.s32 1, %s999_s21  }
  0x67   : > { %s27_s27 = ssub.s32 %s999_s21, %s1182_s28  ;;  %s30_s15 = sadd.s32 1, %s995_s20 }
  0x68   : > { %p28_p1 = scmp.eq.s32.totalorder %s27_s27, 0  ;;  %p37_p3 = scmp.ne.s32.totalorder %s995_s20, %s991_s19 }
  0x69   : > { %p38_p8 = scmp.eq.s32.totalorder %s999_s21, 0  ;;  %p43_p13 = scmp.ne.s32.totalorder %s991_s19, %s987_s18 }
  0x6a   : > { %s1193_s16 = scalar_select %p28_p1, %s995_s20, %s30_s15  }
  0x6b   : > { %p1195_p0 = por %p38_p8, %p37_p3  ;;  %p1341_p2 = scmp.eq.s32.totalorder %s1062_s24, 0 }
  0x6c   : > { %p151_p5 = scmp.eq.s32.totalorder %s1062_s24, 1  ;;  %p157_p7 = scmp.eq.s32.totalorder %s607_s11, 1 }
  0x6d   : > { %p1201_p6 = por %p1341_p2, %p43_p13  ;;  %p725_p9 = scmp.lt.s32.totalorder %s999_s21, 2 }
  0x6e   : > { %s225_s10 = sand.u32 1, %s995_s20   ;;  %p1208_p4 = por %p151_p5, %p37_p3 }
  0x6f   : > { %p1212_p10 = por %p157_p7, %p43_p13  ;;  %s614_s13 = sshll.u32 %s225_s10, 3 }
  0x70   : > { %s1343_s23 = scalar_select %p1208_p4, 1, 0 }
  0x71   : > { %s1344_s12 = scalar_select %p1212_p10, 1, 0 }
  0x72   : > { %s615_s14 = sshll.u32 %s999_s21, 7  ;;  %s229_s30 = scalar_lea.vmem [#allocation2], %s614_s13 }
  0x73   : > { %s1220_s26 = scalar_lea.hbm %s1328_s0, %s615_s14  ;;  %s236_s29 = sshll.u32 %s229_s30, 4  ;;  %s1222_s29 = int_to_ptr.vmem [resolvable:$true] %s236_s29 }
  0x74   : > { %p1226_p11 = pnand %p725_p9, %p1195_p0  ;;  %s226_s7 = scalar_lea.sflag [#allocation3], %s225_s10 }
  0x75   : > { %s895_s11 = scalar_lea.hbm %s1220_s26, 128  ;;  %s900_s13 = scalar_lea.hbm %s1328_s0, 256 }
  0x76   : > { %p896_p12 = scmp.ne.s32.totalorder %s1220_s26, %s895_s11  ;;  %p897_p1 = pneg %p1226_p11 }
  0x77   : > { %p901_p13 = scmp.lt.u32.totalorder %s1220_s26, %s1328_s0  ;;  %p902_p0 = scmp.lt.u32.totalorder %s900_s13, %s895_s11 }
  0x78   : > { %p898_p3 = pnand %p897_p1, %p896_p12  ;;  %p904_p5 = scmp.lt.u32.totalorder %s895_s11, %s1220_s26 }
  0x79   : > { %p903_p2 = por %p902_p0, %p901_p13 }
  0x7a   : > { %p899_p8 = pneg %p898_p3 }
  0x7b   : > { %p905_p7 = por %p904_p5, %p903_p2 }
  0x7d   : > { %p906_p9 = pnand %p905_p7, %p899_p8 }
  0x7f   : > { %909 = shalt.err (!%p906_p9)
}
  0x80   : > { %s910_s10 = scalar_lea.vmem %s1222_s29, 128  ;;  %s1007_s17 = smov [#allocation2]  }
  0x81   : > { %p911_p12 = scmp.ne.s32.totalorder %s1222_s29, %s910_s10  ;;  %s915_s22 = sshll.u32 %s1007_s17, 4  ;;  %s916_s22 = int_to_ptr.vmem [resolvable:$false] %s915_s22 }
  0x82   : > { %s917_s30 = scalar_lea.vmem %s916_s22, 256  ;;  %p918_p4 = scmp.lt.s32.totalorder %s1222_s29, %s916_s22 }
  0x83   : > { %p913_p3 = pnand %p911_p12, %p897_p1  ;;  %p919_p13 = scmp.lt.s32.totalorder %s917_s30, %s910_s10 }
  0x85   : > { %p914_p10 = pneg %p913_p3  ;;  %p920_p0 = por %p919_p13, %p918_p4 }
  0x87   : > { %p921_p2 = pnand %p920_p0, %p914_p10 }
  0x89   : > { %924 = shalt.err (!%p921_p2)
}
  0x8a   : > { %716 = dma.hbm_to_vmem [thread:$0]  (!%p1226_p11), %s1220_s26, 128, %s1222_s29, %s226_s7  }
  0x8b   : > { %p1346_p8 = scmp.ne.s32.totalorder %s1337_s25, 0 }
  0x8c   : > { %s1258_s11 = sand.u32 (!%p1346_p8), 1, %s991_s19  }
  0x8d   : > { %245 = sbr.rel (%p1346_p8) target bundleno = 632 (0x278), region = 40  ;;  %s617_s27 = sshll.u32 (!%p1346_p8), %s1258_s11, 3 }
  0x8e   : > { %s248_s15 = scalar_lea.sflag (!%p1346_p8), [#allocation3], %s1258_s11  ;;  %s251_s13 = scalar_lea.vmem (!%p1346_p8), [#allocation2], %s617_s27 }
  0x94   : > { %970 = dma.done.wait (%p1201_p6), %s248_s15, 128  }
  0x95   : > { %972 = vsyncadd (%p1201_p6), %s248_s15, 4294967168  ;;  %p1347_p4 = scmp.eq.s32.totalorder %s1062_s24, 0 }
  0x97   : > { %974 = dma.done.wait (%p1347_p4), [#allocation6], 272   ;;  %p1348_p10 = pmov %p1347_p4 }
  0x98   : > { %p1349_p11 = pmov %p1347_p4 }
  0x99   : > { %976 = vsyncadd (%p1348_p10), [#allocation6], 4294967024 }
  0x9a   : > { %978 = dma.done.wait (%p1349_p11), [#allocation9], 1040   ;;  %p1350_p1 = pmov %p1347_p4 }
  0x9b   : > { %v1008_v0 = vmov 0.0   ;;  %vm1009_vm0 = vmmov 0   ;;  %v771_v1 = vld [vmem:[#allocation5] sm:$0xff]   ;;  %v772_v2 = vld [vmem:[#allocation5 + $0x8] sm:$0xff]   ;;  %v295_v3 = vld [vmem:[%s251_s13] sm:$0xff]  ;;  %vm320_vm1 = vcmask 261120  }
  0x9c   : > { %980 = vsyncadd (%p1350_p1), [#allocation9], 4294966256  ;;  %652 = vmatprep.subr.bf16.mxu0 %v1008_v0  ;;  %656 = vmatprep.mubr.msk.bf16.mxu0 %vm1009_vm0, %v1008_v0  ;;  %v773_v4 = vld [vmem:[#allocation8] sm:$0xff]   ;;  %v296_v5 = vpack.c.bf16 %v295_v3, %v295_v3  ;;  %v774_v6 = vld [vmem:[#allocation8 + $0x8] sm:$0xff]   ;;  %s637_s25 = sshll.u32 %s1062_s24, 7  ;;  %s293_s9 = scalar_lea.vmem [#allocation11], %s617_s27 }
  0x9d   : > { %660 = vmatprep.subr.bf16.mxu1 %v1008_v0  ;;  %676 = vmatprep.mubr.msk.bf16.mxu1 %vm1009_vm0, %v1008_v0  ;;  %v775_v7 = vld [vmem:[#allocation8 + $0x10] sm:$0xff]   ;;  %v776_v8 = vld [vmem:[#allocation8 + $0x18] sm:$0xff]   ;;  %v777_v9 = vld [vmem:[#allocation8 + $0x20] sm:$0xff]   ;;  %s499_s26 = sshll.u32 %s293_s9, 4  ;;  %s1283_s7 = scalar_lea.hbm %s1333_s5, %s637_s25  ;;  %s1285_s26 = int_to_ptr.vmem [resolvable:$true] %s499_s26 }
  0x9e   : > { %653 = vmatpush3.bf16.msra.mxu0 %v771_v1  ;;  %661 = vmatpush3.bf16.msra.mxu1 %v773_v4  ;;  %v778_v10 = vld [vmem:[#allocation8 + $0x28] sm:$0xff]   ;;  %v779_v11 = vld [vmem:[#allocation8 + $0x30] sm:$0xff]   ;;  %v780_v12 = vld [vmem:[#allocation8 + $0x38] sm:$0xff]   ;;  %s486_s24 = scalar_lea.sflag [#allocation4], %s1258_s11  ;;  %s925_s8 = scalar_lea.vmem %s1285_s26, 128 }
  0x9f   : > { %654 = vmatprep.subr.bf16.mxu0 %v1008_v0  ;;  %662 = vmatprep.subr.bf16.mxu1 %v1008_v0  ;;  %v623_v13 = vld [vmem:[#allocation7] ss:$0 sm:$0xff]  ;;  %v627_v28 = vld [vmem:[#allocation10] ss:$0 sm:$0xff]  ;;  %p926_p6 = scmp.ne.s32.totalorder %s1285_s26, %s925_s8  ;;  %p1351_p5 = scmp.ne.s32.totalorder %s1343_s23, 0 }
  0xa0   : > { %s1010_s14 = smov [#allocation11]  }
  0xa1   : > { %p927_p7 = pnand %p926_p6, %p1351_p5  ;;  %s929_s10 = sshll.u32 %s1010_s14, 4  ;;  %s930_s10 = int_to_ptr.vmem [resolvable:$false] %s929_s10 }
  0xa2   : > { %655 = vmatpush3.bf16.msra.mxu0 %v772_v2  ;;  %663 = vmatpush3.bf16.msra.mxu1 %v774_v6  ;;  %s931_s17 = scalar_lea.vmem %s930_s10, 256  ;;  %p932_p12 = scmp.lt.s32.totalorder %s1285_s26, %s930_s10 }
  0xa3   : > { %664 = vmatprep.subr.bf16.mxu1 %v1008_v0  ;;  %p928_p9 = pneg %p927_p7  ;;  %p933_p3 = scmp.lt.s32.totalorder %s931_s17, %s925_s8 }
  0xa5   : > { %657 = vmatmul.mubr.msk.bf16.vlgmr.msra.gmra.mrb[0].mxu0 %vm320_vm1, %v296_v5  ;;  %p934_p13 = por %p933_p3, %p932_p12 }
  0xa6   : > { %665 = vmatpush3.bf16.msra.mxu1 %v775_v7 }
  0xa7   : > { %666 = vmatprep.subr.bf16.mxu1 %v1008_v0  ;;  %p935_p0 = pnand %p934_p13, %p928_p9 }
  0xaa   : > { %667 = vmatpush3.bf16.msra.mxu1 %v776_v8 }
  0xab   : > { %668 = vmatprep.subr.bf16.mxu1 %v1008_v0 }
  0xae   : > { %669 = vmatpush3.bf16.msra.mxu1 %v777_v9 }
  0xaf   : > { %670 = vmatprep.subr.bf16.mxu1 %v1008_v0 }
  0xb2   : > { %671 = vmatpush3.bf16.msra.mxu1 %v778_v10 }
  0xb3   : > { %672 = vmatprep.subr.bf16.mxu1 %v1008_v0 }
  0xb6   : > { %673 = vmatpush3.bf16.msra.mxu1 %v779_v11 }
  0xb7   : > { %674 = vmatprep.subr.bf16.mxu1 %v1008_v0 }
  0xba   : > { %675 = vmatpush3.bf16.msra.mxu1 %v780_v12 }
 0x178   : > { %v358_v14 = vpop.f32.mrb[0].mxu0 }
 0x179   : > { %v359_v15 = vadd.f32 %v623_v13, %v358_v14  ;;  %v658_v16 = vpop.f32.mrb[1].mxu0 }
 0x17a   : > { %v361_v17 = vpop.f32.mrb[2].mxu0 }
 0x17b   : > { %v364_v18 = vmul.f32 %v359_v15, %v359_v15  ;;  %v659_v19 = vpop.f32.mrb[3].mxu0  ;;  %v368_v24 = vmul.f32 0.5, %v359_v15 }
 0x17d   : > { %v365_v20 = vmul.f32 0.035677407, %v364_v18 }
 0x17f   : > { %v366_v21 = vadd.f32 0.7978846, %v365_v20 }
 0x181   : > { %v367_v22 = vmul.f32 %v366_v21, %v359_v15 }
 0x183   : > { %781 = vtanh.f32 %v367_v22 }
 0x18d   : > { %v782_v23 = vpop.eup %781 }
 0x18e   : > { %v370_v25 = vadd.f32 1.0, %v782_v23 }
 0x190   : > { %v371_v26 = vmul.f32 %v370_v25, %v368_v24 }
 0x192   : > { %v372_v27 = vpack.c.bf16 %v371_v26, %v371_v26 }
 0x194   : > { %677 = vmatmul.mubr.bf16.vlgmr.msra.gmra.mrb[0].mxu1 %v372_v27 }
 0x267   : > { %v478_v29 = vpop.f32.mrb[0].mxu1 }
 0x268   : > { %v479_v30 = vadd.f32 %v627_v28, %v478_v29  ;;  %v678_v31 = vpop.f32.mrb[1].mxu1 }
 0x269   : > { %v481_v32 = vpop.f32.mrb[2].mxu1 }
 0x26a   : > { %v679_v33 = vpop.f32.mrb[3].mxu1  ;;  %484 = vst.msk [vmem:[%s293_s9] sm:$0xff] %vm320_vm1, %v479_v30 }
 0x26b   : > { %938 = shalt.err (!%p935_p0)
}
 0x26c   : > { %s939_s22 = scalar_lea.hbm %s1283_s7, 128  ;;  %s943_s27 = scalar_lea.hbm %s1333_s5, 256 }
 0x26d   : > { %p940_p2 = scmp.ne.s32.totalorder %s1283_s7, %s939_s22  ;;  %p944_p10 = scmp.lt.u32.totalorder %s1283_s7, %s1333_s5 }
 0x26e   : > { %p945_p11 = scmp.lt.u32.totalorder %s943_s27, %s939_s22  ;;  %p947_p6 = scmp.lt.u32.totalorder %s939_s22, %s1283_s7 }
 0x26f   : > { %p941_p8 = pnand %p940_p2, %p1351_p5 }
 0x270   : > { %p946_p1 = por %p945_p11, %p944_p10 }
 0x271   : > { %p942_p4 = pneg %p941_p8 }
 0x272   : > { %p948_p7 = por %p947_p6, %p946_p1 }
 0x274   : > { %p949_p9 = pnand %p948_p7, %p942_p4 }
 0x276   : > { %952 = shalt.err (!%p949_p9)
}
 0x277   : > { %698 = dma.vmem_to_hbm [thread:$0]  (%p1351_p5), %s1285_s26, 128, %s1283_s7, %s486_s24  }
 0x278 PF: > { %s511_s25 = sand.u32 1, %s987_s18   ;;  %p1352_p12 = scmp.ne.s32.totalorder %s1344_s12, 0 }
 0x279   : > { %p1353_p3 = scmp.ge.s32.totalorder %s999_s21, 2  ;;  %s512_s9 = scalar_lea.sflag [#allocation4], %s511_s25 }
 0x27b   : > { %p718_p13 = pnand %p1353_p3, %p1352_p12 }
 0x27d   : > { %982 = dma.done.wait (!%p718_p13), %s512_s9, 128  }
 0x27e   : > { %984 = vsyncadd (!%p718_p13), %s512_s9, 4294967168  ;;  %p20_p0 = scmp.ge.s32.totalorder %s1182_s28, 4   ;;  %s1354_s18 = smov %s991_s19 }
 0x27f   : > { %s1355_s19 = smov %s995_s20  ;;  %s1356_s20 = smov %s1193_s16 }
 0x280   : > { %s1357_s21 = smov %s1182_s28  ;;  %22 = sbr.rel (!%p20_p0) target bundleno = 7 (0x7), region = 101 }
 0x287   :  { %517 = vsyncpa [#allocation3], 1 }
 0x288   :  { %519 = vsyncpa [#allocation3 + $0x1], 1 }
 0x289   :  { %520 = vsyncpa [#allocation6], 1 }
 0x28a   :  { %521 = vsyncpa [#allocation9], 1 }
 0x28b   :  { %522 = vsyncpa [#allocation4], 1 }
 0x28c   :  { %524 = vsyncpa [#allocation4 + $0x1], 1 }

</bundles_post_ra>
